<compile_context>
chip_gen: v5e
topology: v5e:2x2
jax: 0.10.0
libtpu: 0.0.40
codegen_flags: <defaults>
</compile_context>

<pallas_src>
from functools import partial

import jax
import jax.numpy as jnp
from jax.experimental import pallas as pl
from jax.experimental.pallas import tpu as pltpu


def _round_up(x, m):
    return ((x + m - 1) // m) * m


def _sigmoid(x):
    # Explicit exp + divide: exp on the EUP, everything else f32 on the VPU.
    return 1.0 / (1.0 + jnp.exp(-x))


def _qnet_kernel(ms_ref, act_ref, w_ref, col_ref, out_ref):
    M = ms_ref.shape[0]          # (sublane-padded) model-state length
    A = act_ref.shape[0]         # action feature length
    L = w_ref.shape[1]           # latent dimension

    # ---- packed parameter views (static slices -> zero-cost Ref views) -----
    w1t = w_ref[0:M, :]                                    # (M, L) fc1 weight^T
    w3m = w_ref[M:M + L, :]                                # (L, L) fc3 latent block (out x in)
    b1 = w_ref[M + L:M + L + 1, :]                         # (1, L)
    w3a = col_ref[:, 0:A]                                  # (L, A) fc3 action block (MXU dtype)
    b3 = col_ref[:, A:A + 1].astype(jnp.float32)           # (L, 1)
    wp = col_ref[:, A + 1:A + 2].astype(jnp.float32)       # (L, 1) prediction weights
    bp = col_ref[0:1, A + 2:A + 3].astype(jnp.float32)     # (1, 1) prediction bias

    # ---- batch-invariant prologue: VPU mul + XLU reduces, no MXU -----------
    # latent = sigmoid(model_state @ fc1_w^T + fc1_b)                 -> (1, L)
    latent = _sigmoid(jnp.sum(w1t * ms_ref[...], axis=0, keepdims=True) + b1)
    # bias_eff = fc3_w[:, :L] @ latent^T + fc3_b                      -> (L, 1)
    bias_eff = jnp.sum(w3m * latent, axis=1, keepdims=True) + b3

    # ---- per-tile batch work: single MXU matmul, f32 accumulation ----------
    # h^T = sigmoid(fc3_w[:, L:] @ action^T + bias_eff)               -> (L, tile_B)
    h_t = _sigmoid(
        jnp.dot(w3a, act_ref[...], preferred_element_type=jnp.float32) + bias_eff)

    # predictions = pred_w @ h^T + pred_b, as VPU mul + sublane reduce:
    # lane-dense (1, tile_B) row store (no masked vst, no N=1 MXU matmul).
    out_ref[...] = jnp.sum(h_t * wp, axis=0, keepdims=True) + bp


@partial(jax.jit, static_argnames=("tile_b",))
def query_network_dqn_forward(model_state, action_input, packed, *, tile_b=512):
    """model_state: (M,) / (1, M); action_input: (B, A) or (A,);
    packed: output of prepare_params().  Returns (B, 1) f32 Q-values."""
    if action_input.ndim < 2:
        action_input = action_input[None, :]
    B, A = action_input.shape

    w_slab, col_slab = packed["w_slab"], packed["col_slab"]
    L = w_slab.shape[1]
    Mp = w_slab.shape[0] - L - 1                 # sublane-padded model-state length

    # Model state as an (Mp, 1) f32 column (zero rows beyond the true M).
    ms = model_state.reshape(-1).astype(jnp.float32)
    ms = jnp.pad(ms, (0, Mp - ms.shape[0]))[:, None]

    # Action batch as a lane-major (A, B_pad) stream in the MXU dtype.
    # TODO(synk): callers with very large B should supply the (A, B) layout
    # directly so this wrapper-side transpose of the action stream disappears.
    tb = tile_b if B > tile_b else _round_up(B, 128)
    b_pad = _round_up(B, tb)
    act_t = jnp.pad(action_input.astype(col_slab.dtype).T, ((0, 0), (0, b_pad - B)))

    n_blocks = b_pad // tb
    cost = pl.CostEstimate(
        flops=2 * L * A * b_pad + 2 * L * b_pad + n_blocks * (2 * Mp * L + 2 * L * L),
        transcendentals=L * b_pad + n_blocks * L,
        bytes_accessed=(act_t.size * act_t.dtype.itemsize + b_pad * 4 + Mp * 4
                        + w_slab.size * 4 + col_slab.size * col_slab.dtype.itemsize),
    )

    out_row = pl.pallas_call(
        _qnet_kernel,
        out_shape=jax.ShapeDtypeStruct((1, b_pad), jnp.float32),
        grid=(n_blocks,),
        in_specs=[
            pl.BlockSpec((Mp, 1), lambda i: (0, 0)),           # model-state column
            pl.BlockSpec((A, tb), lambda i: (0, i)),           # action stream (lane-tiled)
            pl.BlockSpec(w_slab.shape, lambda i: (0, 0)),      # resident weight slab
            pl.BlockSpec(col_slab.shape, lambda i: (0, 0)),    # resident column slab
        ],
        out_specs=pl.BlockSpec((1, tb), lambda i: (0, i)),     # lane-dense output row
        compiler_params=pltpu.CompilerParams(
            dimension_semantics=("parallel",)),                # shards B tiles on v7x's 2 TCs
        cost_estimate=cost,
    )(ms, act_t, w_slab, col_slab)

    return out_row[0, :B][:, None]                             # (B, 1)


def prepare_params(params, act_dtype=jnp.bfloat16):
    """One-time packing/transposition of the module parameters (hoisted out of
    the per-call path).

    w_slab   (f32): rows = [fc1_w^T (rows zero-padded to a multiple of 8);
                            fc3_w[:, :L]; fc1_b]
    col_slab      : cols = [fc3_w[:, L:] | fc3_b | pred_w | pred_b], cast to
                    `act_dtype` (bf16 default; f32 accumulation in-kernel).
    """
    f32 = jnp.float32
    fc1_w = params["fc1_w"].astype(f32)            # (L, M)
    fc3_w = params["fc3_w"].astype(f32)            # (L, L + A)
    L, M = fc1_w.shape
    A = fc3_w.shape[1] - L
    assert L % 8 == 0, "latent dimension assumed sublane-aligned (multiple of 8)"

    Mp = _round_up(M, 8)
    w1t = jnp.zeros((Mp, L), f32).at[:M, :].set(fc1_w.T)
    w_slab = jnp.concatenate(
        [w1t, fc3_w[:, :L], params["fc1_b"].astype(f32)[None, :]], axis=0)

    col_slab = jnp.concatenate(
        [fc3_w[:, L:],                                               # (L, A)
         params["fc3_b"].astype(f32)[:, None],                       # (L, 1)
         params["pred_w"].astype(f32).reshape(L, 1),                 # (L, 1)
         jnp.full((L, 1), params["pred_b"].astype(f32).reshape(()))],  # (L, 1)
        axis=1).astype(act_dtype)                                    # (L, A + 3)
    return dict(w_slab=w_slab, col_slab=col_slab)


def init_params(key, model_state_length, action_state_length,
                model_state_latent_dimension, bias_average):
    """Deterministic synthetic parameters matching the PyTorch module's shapes."""
    M, A, L = model_state_length, action_state_length, model_state_latent_dimension
    ks = jax.random.split(key, 6)

    def lin(kw, kb, fan_in, fan_out):
        bound = 1.0 / jnp.sqrt(fan_in)
        w = jax.random.uniform(kw, (fan_out, fan_in), jnp.float32, -bound, bound)
        b = jax.random.uniform(kb, (fan_out,), jnp.float32, -bound, bound)
        return w, b

    fc1_w, fc1_b = lin(ks[0], ks[1], M, L)
    fc3_w, fc3_b = lin(ks[2], ks[3], A + L, L)
    _, pred_b = lin(ks[4], ks[5], L, 1)
    # nn.init.constant_(self.predictions.weight, bias_average)
    pred_w = jnp.full((1, L), bias_average, jnp.float32)
    return dict(fc1_w=fc1_w, fc1_b=fc1_b, fc3_w=fc3_w, fc3_b=fc3_b,
                pred_w=pred_w, pred_b=pred_b)


def _reference(model_state, action_input, params):
    latent = jax.nn.sigmoid(model_state[None, :] @ params["fc1_w"].T + params["fc1_b"])
    B = action_input.shape[0]
    cat = jnp.concatenate([jnp.tile(latent, (B, 1)), action_input], axis=1)
    h = jax.nn.sigmoid(cat @ params["fc3_w"].T + params["fc3_b"])
    return h @ params["pred_w"].T + params["pred_b"]


if __name__ == "__main__":
    # Small shapes consistent with the module's forward.
    model_state_length = 32
    action_state_length = 16
    model_state_latent_dimension = 32
    bias_average = 0.1
    batch = 8

    key = jax.random.PRNGKey(0)
    kp, km, ka, kb = jax.random.split(key, 4)

    params = init_params(kp, model_state_length, action_state_length,
                         model_state_latent_dimension, bias_average)

    model_state = jax.random.normal(km, (model_state_length,), jnp.float32)
    action_input = jax.random.normal(ka, (batch, action_state_length), jnp.float32)
    ref = _reference(model_state, action_input, params)

    # 1) Default path: bf16 action stream / MXU weights, f32 accumulation.
    packed = prepare_params(params)                       # one-time weight prep (hoisted)
    q = jax.block_until_ready(query_network_dqn_forward(model_state, action_input, packed))
    assert q.shape == (batch, 1)
    assert jnp.allclose(q, ref, atol=3e-2, rtol=0.0), float(jnp.max(jnp.abs(q - ref)))

    # 2) Exact f32 path: tight check of the kernel math.
    packed_f32 = prepare_params(params, act_dtype=jnp.float32)
    q32 = jax.block_until_ready(query_network_dqn_forward(model_state, action_input, packed_f32))
    assert jnp.allclose(q32, ref, atol=1e-4, rtol=1e-4), float(jnp.max(jnp.abs(q32 - ref)))

    # 3) Multi-block grid path (exercises B padding + tiled lane-dense output).
    action_big = jax.random.normal(kb, (300, action_state_length), jnp.float32)
    q_big = jax.block_until_ready(
        query_network_dqn_forward(model_state, action_big, packed_f32, tile_b=128))
    ref_big = _reference(model_state, action_big, params)
    assert q_big.shape == (300, 1)
    assert jnp.allclose(q_big, ref_big, atol=1e-4, rtol=1e-4), float(jnp.max(jnp.abs(q_big - ref_big)))

    print("KERNEL_OK")
</pallas_src>

<mosaic_0001>
module attributes {stable_mosaic.version = 11 : i64} {
  func.func @_qnet_kernel(%arg0: i32, %arg1: memref<32x1xf32, #tpu.memory_space<vmem>>, %arg2: memref<16x128xbf16, #tpu.memory_space<vmem>>, %arg3: memref<65x32xf32, #tpu.memory_space<vmem>>, %arg4: memref<32x19xbf16, #tpu.memory_space<vmem>>, %arg5: memref<1x128xf32, #tpu.memory_space<vmem>>) attributes {dimension_semantics = [#tpu.dimension_semantics<parallel>], iteration_bounds = array<i64: 1>, scalar_prefetch = 0 : i64, scratch_operands = 0 : i64, tpu.core_type = #tpu.core_type<tc>, window_params = [{pipeline_mode = #tpu.pipeline_mode<synchronous>, transform_indices = @transform_0, window_bounds = array<i64: 32, 1>}, {transform_indices = @transform_1, window_bounds = array<i64: 16, 128>}, {pipeline_mode = #tpu.pipeline_mode<synchronous>, transform_indices = @transform_2, window_bounds = array<i64: 65, 32>}, {pipeline_mode = #tpu.pipeline_mode<synchronous>, transform_indices = @transform_3, window_bounds = array<i64: 32, 19>}, {transform_indices = @transform_4, window_bounds = array<i64: 1, 128>}]} {
    %c0 = arith.constant 0 : index
    %c0_0 = arith.constant 0 : index
    %0 = vector.load %arg3[%c0, %c0_0] : memref<65x32xf32, #tpu.memory_space<vmem>>, vector<32x32xf32>
    %c32 = arith.constant 32 : index
    %c0_1 = arith.constant 0 : index
    %1 = vector.load %arg3[%c32, %c0_1] : memref<65x32xf32, #tpu.memory_space<vmem>>, vector<32x32xf32>
    %c64 = arith.constant 64 : index
    %c0_2 = arith.constant 0 : index
    %2 = vector.load %arg3[%c64, %c0_2] : memref<65x32xf32, #tpu.memory_space<vmem>>, vector<1x32xf32>
    %c0_3 = arith.constant 0 : index
    %c0_4 = arith.constant 0 : index
    %3 = vector.load %arg4[%c0_3, %c0_4] : memref<32x19xbf16, #tpu.memory_space<vmem>>, vector<32x16xbf16>
    %c0_5 = arith.constant 0 : index
    %c16 = arith.constant 16 : index
    %4 = vector.load %arg4[%c0_5, %c16] : memref<32x19xbf16, #tpu.memory_space<vmem>>, vector<32x1xbf16>
    %5 = arith.extf %4 : vector<32x1xbf16> to vector<32x1xf32>
    %c0_6 = arith.constant 0 : index
    %c17 = arith.constant 17 : index
    %6 = vector.load %arg4[%c0_6, %c17] : memref<32x19xbf16, #tpu.memory_space<vmem>>, vector<32x1xbf16>
    %7 = arith.extf %6 : vector<32x1xbf16> to vector<32x1xf32>
    %c0_7 = arith.constant 0 : index
    %c18 = arith.constant 18 : index
    %8 = vector.load %arg4[%c0_7, %c18] : memref<32x19xbf16, #tpu.memory_space<vmem>>, vector<1x1xbf16>
    %9 = arith.extf %8 : vector<1x1xbf16> to vector<1x1xf32>
    %c0_8 = arith.constant 0 : index
    %c0_9 = arith.constant 0 : index
    %10 = vector.load %arg1[%c0_8, %c0_9] : memref<32x1xf32, #tpu.memory_space<vmem>>, vector<32x1xf32>
    %11 = vector.broadcast %10 : vector<32x1xf32> to vector<32x32xf32>
    %12 = arith.mulf %0, %11 : vector<32x32xf32>
    %cst = arith.constant dense<0.000000e+00> : vector<32xf32>
    %13 = vector.multi_reduction <add>, %12, %cst [0] : vector<32x32xf32> to vector<32xf32>
    %14 = vector.shape_cast %13 : vector<32xf32> to vector<1x32xf32>
    %15 = arith.addf %14, %2 : vector<1x32xf32>
    %cst_10 = arith.constant 0.000000e+00 : f32
    %16 = vector.broadcast %cst_10 : f32 to vector<1x32xf32>
    %17 = arith.subf %16, %15 : vector<1x32xf32>
    %18 = math.exp %17 : vector<1x32xf32>
    %cst_11 = arith.constant 1.000000e+00 : f32
    %19 = vector.broadcast %cst_11 : f32 to vector<1x32xf32>
    %20 = arith.addf %19, %18 : vector<1x32xf32>
    %cst_12 = arith.constant 1.000000e+00 : f32
    %21 = vector.broadcast %cst_12 : f32 to vector<1x32xf32>
    %22 = arith.divf %21, %20 : vector<1x32xf32>
    %23 = vector.broadcast %22 : vector<1x32xf32> to vector<32x32xf32>
    %24 = arith.mulf %1, %23 : vector<32x32xf32>
    %cst_13 = arith.constant dense<0.000000e+00> : vector<32xf32>
    %25 = vector.multi_reduction <add>, %24, %cst_13 [1] : vector<32x32xf32> to vector<32xf32>
    %26 = vector.shape_cast %25 : vector<32xf32> to vector<32x1xf32>
    %27 = arith.addf %26, %5 : vector<32x1xf32>
    %c0_14 = arith.constant 0 : index
    %c0_15 = arith.constant 0 : index
    %28 = vector.load %arg2[%c0_14, %c0_15] : memref<16x128xbf16, #tpu.memory_space<vmem>>, vector<16x128xbf16>
    %cst_16 = arith.constant dense<0.000000e+00> : vector<32x128xf32>
    %29 = tpu.matmul %3, %28, %cst_16 {dimension_numbers = #tpu.dot_dimension_numbers<[1], [0], [0], [1], [0, 0, 1, 1], [], []>} : vector<32x16xbf16>, vector<16x128xbf16>, vector<32x128xf32> -> vector<32x128xf32>
    %30 = vector.broadcast %27 : vector<32x1xf32> to vector<32x128xf32>
    %31 = arith.addf %29, %30 : vector<32x128xf32>
    %cst_17 = arith.constant 0.000000e+00 : f32
    %32 = vector.broadcast %cst_17 : f32 to vector<32x128xf32>
    %33 = arith.subf %32, %31 : vector<32x128xf32>
    %34 = math.exp %33 : vector<32x128xf32>
    %cst_18 = arith.constant 1.000000e+00 : f32
    %35 = vector.broadcast %cst_18 : f32 to vector<32x128xf32>
    %36 = arith.addf %35, %34 : vector<32x128xf32>
    %cst_19 = arith.constant 1.000000e+00 : f32
    %37 = vector.broadcast %cst_19 : f32 to vector<32x128xf32>
    %38 = arith.divf %37, %36 : vector<32x128xf32>
    %39 = vector.broadcast %7 : vector<32x1xf32> to vector<32x128xf32>
    %40 = arith.mulf %38, %39 : vector<32x128xf32>
    %cst_20 = arith.constant dense<0.000000e+00> : vector<128xf32>
    %41 = vector.multi_reduction <add>, %40, %cst_20 [0] : vector<32x128xf32> to vector<128xf32>
    %42 = vector.shape_cast %41 : vector<128xf32> to vector<1x128xf32>
    %43 = vector.broadcast %9 : vector<1x1xf32> to vector<1x128xf32>
    %44 = arith.addf %42, %43 : vector<1x128xf32>
    %c0_21 = arith.constant 0 : index
    %c0_22 = arith.constant 0 : index
    %45 = vector.load %arg5[%c0_21, %c0_22] : memref<1x128xf32, #tpu.memory_space<vmem>>, vector<1x128xf32>
    tpu.vector_store %arg5[%c0_21, %c0_22], %44 {strides = array<i32>} : memref<1x128xf32, #tpu.memory_space<vmem>>, vector<1x128xf32>,
    return
  }
  func.func @transform_0(%arg0: i32) -> (i32, i32) {
    %c0_i32 = arith.constant 0 : i32
    %c0_i32_0 = arith.constant 0 : i32
    %c0_i32_1 = arith.constant 0 : i32
    return %c0_i32, %c0_i32_0 : i32, i32
  }
  func.func @transform_1(%arg0: i32) -> (i32, i32) {
    %c0_i32 = arith.constant 0 : i32
    %c0_i32_0 = arith.constant 0 : i32
    return %c0_i32, %arg0 : i32, i32
  }
  func.func @transform_2(%arg0: i32) -> (i32, i32) {
    %c0_i32 = arith.constant 0 : i32
    %c0_i32_0 = arith.constant 0 : i32
    %c0_i32_1 = arith.constant 0 : i32
    return %c0_i32, %c0_i32_0 : i32, i32
  }
  func.func @transform_3(%arg0: i32) -> (i32, i32) {
    %c0_i32 = arith.constant 0 : i32
    %c0_i32_0 = arith.constant 0 : i32
    %c0_i32_1 = arith.constant 0 : i32
    return %c0_i32, %c0_i32_0 : i32, i32
  }
  func.func @transform_4(%arg0: i32) -> (i32, i32) {
    %c0_i32 = arith.constant 0 : i32
    %c0_i32_0 = arith.constant 0 : i32
    return %c0_i32, %arg0 : i32, i32
  }
}

</mosaic_0001>

<bundles_post_ra>
// kernel: query_network_dqn_forward.1
= control target key start
LH: loop header
LB: loop body
LE: loop exit
PB: predicated region body
PF: predicated region fallthrough
CT: control target
= control target key end

     0   :  { %v363_v0 = vmov 0   ;;  %vm65_vm0 = vcmask 261120   ;;  %vm158_vm1 = vcmask 130048   ;;  %v364_v63 = vmov 16   ;;  %s480_s0 = inlined_call_operand.vmem [shape: f32[32,1], index: 0, kind: input, shape index: {}]   ;;  %s481_s2 = inlined_call_operand.vmem [shape: f32[65,32], index: 2, kind: input, shape index: {}]   ;;  %s482_s1 = inlined_call_operand.vmem [shape: bf16[16,128], index: 1, kind: input, shape index: {}]   ;;  %s483_s3 = inlined_call_operand.vmem [shape: bf16[32,19], index: 3, kind: input, shape index: {}]   ;;  %s484_s4 = inlined_call_operand.vmem [shape: f32[1,128], index: 4, kind: output, shape index: {}]  }
   0x1   :  { %327 = vset.pattern.permute.xlu1 %v363_v0  ;;  %326 = vset.pattern.permute.xlu0 %v363_v0  ;;  %v39_v1 = vld [vmem:[%s480_s0 + $0x10] sm:$0xff]  ;;  %v37_v2 = vld [vmem:[%s480_s0] sm:$0xff]  ;;  %v40_v3 = vld [vmem:[%s480_s0 + $0x18] sm:$0xff] }
   0x2   :  { %53 = vperm.xlu1 %327, %v39_v1   ;;  %43 = vperm.xlu0 %326, %v37_v2   ;;  %v38_v4 = vld [vmem:[%s480_s0 + $0x8] sm:$0xff]  ;;  %v18_v7 = vld [vmem:[%s481_s2] sm:$0xff]  ;;  %v20_v8 = vld [vmem:[%s481_s2 + $0x10] sm:$0xff]  ;;  %v365_v1 = vmov 17  }
   0x3   :  { %v19_v9 = vld [vmem:[%s481_s2 + $0x8] sm:$0xff]  ;;  %v21_v11 = vld [vmem:[%s481_s2 + $0x18] sm:$0xff]  ;;  %v26_v29 = vld [vmem:[%s481_s2 + $0x40] sm:$0x1]  ;;  %328 = vset.pattern.permute.xlu2 %v364_v63 }
   0x4   :  { %v320_v36 = vld [vmem:[%s482_s1] sm:$0xff]  ;;  %v319_v38 = vld [vmem:[%s483_s3 + $0x8] sm:$0xff]  ;;  %v25_v47 = vld [vmem:[%s481_s2 + $0x38] sm:$0xff] }
   0x5   :  { %v318_v37 = vld [vmem:[%s483_s3] sm:$0xff]  ;;  %172 = vmatpush.bf16.msra.mxu0 %v320_v36  ;;  %321 = vmatpush.bf16.msra.mxu1 %v320_v36  ;;  %v24_v50 = vld [vmem:[%s481_s2 + $0x30] sm:$0xff]  ;;  %v23_v52 = vld [vmem:[%s481_s2 + $0x28] sm:$0xff] }
   0x6   :  { %v22_v51 = vld [vmem:[%s481_s2 + $0x20] sm:$0xff] }
   0x7   :  { %v27_v62 = vld [vmem:[%s483_s3] sm:$0xff]  }
   0x8   :  { %316 = vmatmul.msk.bf16.vlgmr.msra.gmra.mxu0 %vm158_vm1, %v318_v37  ;;  %317 = vmatmul.msk.bf16.vlgmr.msra.gmra.mxu1 %vm158_vm1, %v319_v38  ;;  %v32_v0 = vunpack.c.h.bf16 %v27_v62  ;;  %v31_v2 = vunpack.c.l.bf16 %v27_v62 }
   0xa   :  { %58 = vperm.xlu1 %327, %v40_v3   ;;  %48 = vperm.xlu0 %326, %v38_v4   ;;  %v330_v3 = vpack.i.bf16 %v32_v0, %v31_v2  ;;  %v30_v4 = vld [vmem:[%s483_s3 + $0x8] sm:$0xff]  }
  0x12   :  { %329 = vset.pattern.permute.xlu0 %v365_v1  ;;  %335 = vset.pattern.permute.xlu1 %v365_v1 }
  0x74   :  { %v54_v5 = vpop.permute.xlu1 %53  ;;  %v44_v6 = vpop.permute.xlu0 %43 }
  0x75   :  { %v61_v10 = vmul.f32 %v44_v6, %v18_v7  ;;  %v63_v14 = vmul.f32 %v54_v5, %v20_v8  ;;  %v34_v5 = vunpack.c.h.bf16 %v30_v4  ;;  %v33_v6 = vunpack.c.l.bf16 %v30_v4 }
  0x76   :  { %v366_v8 = vmov 18  }
  0x77   :  { %v66_v16 = vsel %vm65_vm0, %v61_v10, 0.0  ;;  %v69_v20 = vsel %vm65_vm0, %v63_v14, 0.0  ;;  %v336_v7 = vpack.i.bf16 %v34_v5, %v33_v6 }
  0x7c   :  { %v59_v12 = vpop.permute.xlu1 %58  ;;  %v49_v13 = vpop.permute.xlu0 %48 }
  0x7d   :  { %v62_v15 = vmul.f32 %v49_v13, %v19_v9  ;;  %v64_v17 = vmul.f32 %v59_v12, %v21_v11 }
  0x7f   :  { %v67_v18 = vsel %vm65_vm0, %v62_v15, 0.0  ;;  %v71_v22 = vsel %vm65_vm0, %v64_v17, 0.0  ;;  %v35_v17 = vld [vmem:[%s483_s3] sm:$0x1] }
  0x80   :  { %v68_v19 = vadd.f32 %v67_v18, %v66_v16  ;;  %v36_v18 = vunpack.c.l.bf16 %v35_v17 }
  0x82   :  { %v70_v21 = vadd.f32 %v69_v20, %v68_v19 }
  0x84   :  { %v72_v23 = vadd.f32 %v71_v22, %v70_v21 }
  0x85   :  { %v174_v19 = vpop.f32.mrf.mxu0 }
  0x86   :  { %v73_v24 = vrot.slane %v72_v23, 4 }
  0x88   :  { %v74_v25 = vadd.f32 %v73_v24, %v72_v23 }
  0x8a   :  { %v75_v26 = vrot.slane %v74_v25, 2 }
  0x8c   :  { %v76_v27 = vadd.f32 %v75_v26, %v74_v25 }
  0x8d   :  { %v176_v24 = vpop.f32.mrf.mxu0 }
  0x8e   :  { %v77_v28 = vrot.slane %v76_v27, 1 }
  0x90   :  { %v78_v30 = vadd.f32 %v77_v28, %v76_v27 }
  0x92   :  { %v79_v31 = vadd.f32 %v78_v30, %v26_v29  ;;  %v179_v29 = vpop.f32.mrf.mxu1 }
  0x94   :  { %v80_v32 = vsub.f32 0.0, %v79_v31 }
  0x96   :  { %v81_v33 = vmul.f32 1.442695, %v80_v32 }
  0x98   :  { %343 = vpow2.f32 %v81_v33 }
  0x9a   :  { %v181_v38 = vpop.f32.mrf.mxu1 }
  0x9e   :  { %v344_v34 = vpop.eup %343 }
  0x9f   :  { %v83_v35 = vadd.f32 1.0, %v344_v34 }
  0xa1   :  { %345 = vrcp.f32 %v83_v35  ;;  %v95_v42 = vand.u32 2147483648, %v83_v35  ;;  %v93_v44 = vand.u32 2147483647, %v83_v35  ;;  %vm89_vm3 = vweird.f32 %v83_v35 }
  0xa3   :  { %v96_v46 = vor.u32 1.1754944e-38, %v95_v42  ;;  %vm94_vm5 = vcmp.eq.f32.partialorder %v93_v44, 8.507059e+37 }
  0xa7   :  { %v346_v39 = vpop.eup %345 }
  0xa8   :  { %v85_v40 = vmul.f32 %v346_v39, %v83_v35  ;;  %vm90_vm2 = vweird.f32 %v346_v39 }
  0xa9   :  { %vm91_vm4 = vmor %vm89_vm3, %vm90_vm2 }
  0xaa   :  { %v86_v41 = vsub.f32 1.0, %v85_v40 }
  0xac   :  { %v87_v43 = vmul.f32 %v346_v39, %v86_v41 }
  0xae   :  { %v88_v45 = vadd.f32 %v346_v39, %v87_v43 }
  0xb0   :  { %v92_v48 = vsel %vm91_vm4, %v346_v39, %v88_v45 }
  0xb1   :  { %v97_v49 = vsel %vm94_vm5, %v96_v46, %v92_v48 }
  0xb2   :  { %v99_v53 = vperm.slane %v97_v49, 0 }
  0xb4   :  { %v103_v54 = vmul.f32 %v99_v53, %v25_v47  ;;  %v102_v55 = vmul.f32 %v99_v53, %v24_v50  ;;  %v100_v56 = vmul.f32 %v99_v53, %v22_v51  ;;  %v101_v57 = vmul.f32 %v99_v53, %v23_v52 }
  0xb6   :  { %v113_v58 = vsel %vm65_vm0, %v103_v54, 0.0  ;;  %v110_v59 = vsel %vm65_vm0, %v102_v55, 0.0  ;;  %v104_v60 = vsel %vm65_vm0, %v100_v56, 0.0  ;;  %v107_v61 = vsel %vm65_vm0, %v101_v57, 0.0 }
  0xb7   :  { %114 = vadd.xlane.f32.xlu1 %v113_v58  ;;  %111 = vadd.xlane.f32.xlu0 %v110_v59 }
  0xb8   :  { %105 = vadd.xlane.f32.xlu2 %v104_v60 }
  0xc0   :  { %108 = vadd.xlane.f32.xlu2 %v107_v61 }
  0xcb   :  { %331 = vperm.xlu0 %329, %v330_v3  }
  0xd0   :  { %337 = vperm.xlu1 %335, %v336_v7  }
  0xd3   :  { %342 = vset.pattern.permute.xlu0 %v366_v8 }
 0x12a   :  { %v112_v13 = vpop.xlane.xlu0 %111  ;;  %v115_v15 = vpop.xlane.xlu1 %114 }
 0x12b   :  { %v106_v9 = vpop.xlane.xlu2 %105  ;;  %v118_v14 = vadd.f32 %v112_v13, %v33_v6  ;;  %v119_v16 = vadd.f32 %v115_v15, %v34_v5 }
 0x12c   :  { %v116_v10 = vadd.f32 %v106_v9, %v31_v2 }
 0x12e   :  { %124 = vperm.xlu2 %328, %v116_v10  }
 0x133   :  { %v109_v11 = vpop.xlane.xlu2 %108 }
 0x134   :  { %v117_v12 = vadd.f32 %v109_v11, %v32_v0 }
 0x136   :  { %129 = vperm.xlu2 %328, %v117_v12  }
 0x13d   :  { %v332_v3 = vpop.permute.xlu0 %331 }
 0x13e   :  { %134 = vperm.xlu2 %328, %v118_v14   ;;  %v334_v9 = vunpack.i.h.bf16 %v332_v3  ;;  %v333_v15 = vunpack.i.l.bf16 %v332_v3 }
 0x142   :  { %v338_v11 = vpop.permute.xlu1 %337 }
 0x146   :  { %139 = vperm.xlu2 %328, %v119_v16  }
 0x14e   :  { %341 = vset.pattern.permute.xlu2 %v366_v8 }
 0x14f   :  { %295 = vperm.xlu2 %341, %v36_v18  }
 0x188   :  { %v125_v20 = vpop.permute.xlu2 %124 }
 0x189   :  { %v175_v21 = vadd.f32 %v174_v19, %v125_v20  ;;  %v339_v19 = vunpack.i.l.bf16 %v338_v11 }
 0x18b   :  { %v184_v22 = vsub.f32 0.0, %v175_v21 }
 0x18d   :  { %v188_v23 = vmul.f32 1.442695, %v184_v22 }
 0x18f   :  { %347 = vpow2.f32 %v188_v23 }
 0x190   :  { %v130_v25 = vpop.permute.xlu2 %129 }
 0x191   :  { %v177_v26 = vadd.f32 %v176_v24, %v130_v25 }
 0x193   :  { %v185_v27 = vsub.f32 0.0, %v177_v26 }
 0x195   :  { %v190_v28 = vmul.f32 1.442695, %v185_v27  ;;  %v348_v30 = vpop.eup %347 }
 0x196   :  { %v457_v33 = vadd.f32 1.0, %v348_v30 }
 0x197   :  { %349 = vpow2.f32 %v190_v28 }
 0x198   :  { %v135_v31 = vpop.permute.xlu2 %134  ;;  %351 = vrcp.f32 %v457_v33  ;;  %vm205_vm10 = vweird.f32 %v457_v33  ;;  %v209_v63 = vand.u32 2147483647, %v457_v33  ;;  %v211_v0 = vand.u32 2147483648, %v457_v33 }
 0x199   :  { %v180_v32 = vadd.f32 %v179_v29, %v135_v31 }
 0x19a   :  { %v212_v16 = vor.u32 1.1754944e-38, %v211_v0  ;;  %vm210_vm0 = vcmp.eq.f32.partialorder %v209_v63, 8.507059e+37 }
 0x19b   :  { %v186_v34 = vsub.f32 0.0, %v180_v32  ;;  %v340_v32 = vunpack.i.h.bf16 %v338_v11 }
 0x19d   :  { %v350_v35 = vpop.eup %349  ;;  %v192_v36 = vmul.f32 1.442695, %v186_v34 }
 0x19e   :  { %v197_v37 = vadd.f32 1.0, %v350_v35  ;;  %v352_v42 = vpop.eup %351 }
 0x19f   :  { %353 = vpow2.f32 %v192_v36  ;;  %v201_v47 = vmul.f32 %v352_v42, %v457_v33  ;;  %vm206_vm7 = vweird.f32 %v352_v42 }
 0x1a0   :  { %355 = vrcp.f32 %v197_v37  ;;  %v140_v39 = vpop.permute.xlu2 %139  ;;  %vm220_vm8 = vweird.f32 %v197_v37  ;;  %v226_v59 = vand.u32 2147483648, %v197_v37  ;;  %v224_v61 = vand.u32 2147483647, %v197_v37  ;;  %vm468_vm12 = vmor %vm205_vm10, %vm206_vm7 }
 0x1a1   :  { %v182_v40 = vadd.f32 %v181_v38, %v140_v39  ;;  %v202_v50 = vsub.f32 1.0, %v201_v47 }
 0x1a2   :  { %v227_v10 = vor.u32 1.1754944e-38, %v226_v59  ;;  %vm225_vm15 = vcmp.eq.f32.partialorder %v224_v61, 8.507059e+37 }
 0x1a3   :  { %v187_v41 = vsub.f32 0.0, %v182_v40  ;;  %v203_v55 = vmul.f32 %v352_v42, %v202_v50 }
 0x1a5   :  { %v354_v43 = vpop.eup %353  ;;  %v194_v44 = vmul.f32 1.442695, %v187_v41  ;;  %v204_v60 = vadd.f32 %v352_v42, %v203_v55 }
 0x1a6   :  { %v356_v45 = vpop.eup %355  ;;  %v198_v46 = vadd.f32 1.0, %v354_v43 }
 0x1a7   :  { %357 = vpow2.f32 %v194_v44  ;;  %v216_v48 = vmul.f32 %v356_v45, %v197_v37  ;;  %vm221_vm6 = vweird.f32 %v356_v45  ;;  %v208_v12 = vsel %vm468_vm12, %v352_v42, %v204_v60 }
 0x1a8   :  { %359 = vrcp.f32 %v198_v46  ;;  %vm464_vm11 = vmor %vm220_vm8, %vm221_vm6  ;;  %v241_v2 = vand.u32 2147483648, %v198_v46  ;;  %vm235_vm13 = vweird.f32 %v198_v46  ;;  %v239_v7 = vand.u32 2147483647, %v198_v46 }
 0x1a9   :  { %v217_v49 = vsub.f32 1.0, %v216_v48  ;;  %v213_v21 = vsel %vm210_vm0, %v212_v16, %v208_v12  ;;  %v296_v43 = vpop.permute.xlu2 %295 }
 0x1aa   :  { %v242_v18 = vor.u32 1.1754944e-38, %v241_v2  ;;  %vm240_vm1 = vcmp.eq.f32.partialorder %v239_v7, 8.507059e+37  ;;  %v280_v27 = vmul.f32 %v333_v15, %v213_v21 }
 0x1ab   :  { %v218_v52 = vmul.f32 %v356_v45, %v217_v49 }
 0x1ad   :  { %v358_v51 = vpop.eup %357  ;;  %v219_v57 = vadd.f32 %v356_v45, %v218_v52 }
 0x1ae   :  { %v360_v53 = vpop.eup %359  ;;  %v199_v54 = vadd.f32 1.0, %v358_v51 }
 0x1af   :  { %v231_v56 = vmul.f32 %v360_v53, %v198_v46  ;;  %vm236_vm9 = vweird.f32 %v360_v53  ;;  %v223_v5 = vsel %vm464_vm11, %v356_v45, %v219_v57 }
 0x1b0   :  { %361 = vrcp.f32 %v199_v54  ;;  %vm237_vm14 = vmor %vm235_vm13, %vm236_vm9  ;;  %v228_v17 = vsel %vm225_vm15, %v227_v10, %v223_v5  ;;  %v256_v23 = vand.u32 2147483648, %v199_v54  ;;  %v254_v26 = vand.u32 2147483647, %v199_v54 }
 0x1b1   :  { %v232_v58 = vsub.f32 1.0, %v231_v56  ;;  %v281_v24 = vmul.f32 %v334_v9, %v228_v17  ;;  %vm250_vm3 = vweird.f32 %v199_v54 }
 0x1b2   :  { %v257_v30 = vor.u32 1.1754944e-38, %v256_v23  ;;  %vm255_vm5 = vcmp.eq.f32.partialorder %v254_v26, 8.507059e+37 }
 0x1b3   :  { %v233_v62 = vmul.f32 %v360_v53, %v232_v58  ;;  %v284_v31 = vadd.f32 %v281_v24, %v280_v27 }
 0x1b5   :  { %v234_v6 = vadd.f32 %v360_v53, %v233_v62 }
 0x1b6   :  { %v362_v8 = vpop.eup %361 }
 0x1b7   :  { %v238_v13 = vsel %vm237_vm14, %v360_v53, %v234_v6  ;;  %v246_v14 = vmul.f32 %v362_v8, %v199_v54  ;;  %vm251_vm2 = vweird.f32 %v362_v8 }
 0x1b8   :  { %v243_v22 = vsel %vm240_vm1, %v242_v18, %v238_v13  ;;  %vm252_vm4 = vmor %vm250_vm3, %vm251_vm2 }
 0x1b9   :  { %v247_v20 = vsub.f32 1.0, %v246_v14  ;;  %v282_v29 = vmul.f32 %v339_v19, %v243_v22 }
 0x1bb   :  { %v248_v25 = vmul.f32 %v362_v8, %v247_v20  ;;  %v285_v36 = vadd.f32 %v284_v31, %v282_v29 }
 0x1bd   :  { %v249_v28 = vadd.f32 %v362_v8, %v248_v25 }
 0x1bf   :  { %v253_v33 = vsel %vm252_vm4, %v362_v8, %v249_v28 }
 0x1c0   :  { %v258_v34 = vsel %vm255_vm5, %v257_v30, %v253_v33 }
 0x1c1   :  { %v283_v35 = vmul.f32 %v340_v32, %v258_v34 }
 0x1c3   :  { %v286_v37 = vadd.f32 %v285_v36, %v283_v35 }
 0x1c5   :  { %v287_v38 = vrot.slane %v286_v37, 4 }
 0x1c7   :  { %v288_v39 = vadd.f32 %v287_v38, %v286_v37 }
 0x1c9   :  { %v289_v40 = vrot.slane %v288_v39, 2 }
 0x1cb   :  { %v290_v41 = vadd.f32 %v289_v40, %v288_v39 }
 0x1cd   :  { %v291_v42 = vrot.slane %v290_v41, 1 }
 0x1cf   :  { %v292_v44 = vadd.f32 %v291_v42, %v290_v41 }
 0x1d1   :  { %v298_v45 = vadd.f32 %v296_v43, %v292_v44 }
 0x1d3   :  { %299 = vst [vmem:[%s484_s4] sm:$0x1] %v298_v45 }

</bundles_post_ra>
